<compile_context>
chip_gen: v7x
topology: tpu7x:2x2x1
jax: 0.10.0
libtpu: 0.0.40
codegen_flags: <defaults>
</compile_context>

<pallas_src>
import jax
import jax.numpy as jnp
from jax import lax
from jax.experimental import pallas as pl
from jax.experimental.pallas import tpu as pltpu


def _round_up(n, m):
    return ((n + m - 1) // m) * m


def _make_mlp_kernel(compute_dtype):
    def mlp_kernel(x_ref,
                   w1_ref, b1_ref,
                   w2_ref, b2_ref,
                   w3_ref, b3_ref,
                   w4_ref, b4_ref,
                   w5_ref, b5_ref,
                   o_ref):
        """Full 5-layer MLP forward for one batch tile, entirely in VMEM."""
        h = x_ref[...]
        # fc1..fc4: MXU matmul (f32 accumulate) + bias add + ReLU (VPU).
        # Biases arrive as (1, out) rows so the broadcast-add has an explicit
        # (sublane=1, lane=out) layout.
        for w_ref, b_ref in ((w1_ref, b1_ref), (w2_ref, b2_ref),
                             (w3_ref, b3_ref), (w4_ref, b4_ref)):
            h = jnp.dot(h.astype(compute_dtype), w_ref[...],
                        preferred_element_type=jnp.float32)
            h = jnp.maximum(h + b_ref[...], 0.0)
        # fc5 (out_features == 1): contract the 16-wide feature axis against a
        # (1, 16) weight row so the result is a lane-dense (1, tile_b) slab.
        # This replaces the [tile_b,16]x[16,1] dot + 1-lane masked stores with
        # a single contraction and full-width unmasked stores.
        out = lax.dot_general(
            w5_ref[...], h,
            dimension_numbers=(((1,), (1,)), ((), ())),
            preferred_element_type=jnp.float32)
        out = out + b5_ref[...]
        o_ref[...] = out.astype(o_ref.dtype)

    return mlp_kernel


def net_forward(x, params, *, tile_b=256, compute_dtype=jnp.float32):
    """Pallas-backed forward pass of Net. x: [B, in_dims] -> [B, 1] float32.

    tile_b:        batch tile (M dimension fed to the MXU).  128/256-aligned so
                   v5e (128x128) and v6e/v7x (256x256) MXU tiles are full; with
                   B >= 2*tile_b the 1-D grid has >=2 steps so v7x's two
                   TensorCores both get work via dimension_semantics=parallel.
    compute_dtype: dtype of the matmul operands (activations/weights); pass
                   jnp.bfloat16 on v6e/v7x to halve DMA bytes and hit the bf16
                   MXU.  Accumulation stays in float32 either way.
    """
    (w1, b1), (w2, b2), (w3, b3), (w4, b4), (w5, b5) = params
    B, in_dims = x.shape

    # Effective batch tile: large & 128-aligned for big B, clamped (8-aligned)
    # for tiny B so the single block equals the full array.
    if B > tile_b:
        assert tile_b % 128 == 0, "tile_b must be a multiple of 128 when B > tile_b"
        eff_tile = tile_b
    else:
        eff_tile = _round_up(B, 8)
    b_pad = _round_up(B, eff_tile)
    if b_pad != B:
        x = jnp.pad(x, ((0, b_pad - B), (0, 0)))  # zero rows; outputs discarded
    grid = (b_pad // eff_tile,)

    # Wrapper-side layout of parameters (done once, outside the kernel):
    #   * matmul operands in compute_dtype,
    #   * biases as (1, out) rows,
    #   * fc5 weight as a (1, 16) row, fc5 bias as (1, 1).
    cd = compute_dtype
    x = x.astype(cd)
    w1c, w2c, w3c, w4c = (w.astype(cd) for w in (w1, w2, w3, w4))
    b1r = b1.reshape(1, -1).astype(jnp.float32)
    b2r = b2.reshape(1, -1).astype(jnp.float32)
    b3r = b3.reshape(1, -1).astype(jnp.float32)
    b4r = b4.reshape(1, -1).astype(jnp.float32)
    w5r = w5.reshape(1, -1).astype(jnp.float32)   # (1, 16)
    b5r = b5.reshape(1, 1).astype(jnp.float32)    # (1, 1)

    def const_spec(arr):
        # Constant index_map: block index never changes across the grid, so
        # Pallas keeps the (tiny) parameter resident in VMEM and does not
        # re-issue its DMA every grid step.
        shape = arr.shape
        return pl.BlockSpec(shape, lambda i, _n=len(shape): (0,) * _n)

    in_specs = [
        pl.BlockSpec((eff_tile, in_dims), lambda i: (i, 0)),   # x batch tile
        const_spec(w1c), const_spec(b1r),
        const_spec(w2c), const_spec(b2r),
        const_spec(w3c), const_spec(b3r),
        const_spec(w4c), const_spec(b4r),
        const_spec(w5r), const_spec(b5r),
    ]
    # Output is stored transposed as (1, B_pad): each grid step writes a
    # lane-dense (1, eff_tile) row (unmasked vst), instead of (tile_b, 1)
    # 1-lane masked stores.
    out_spec = pl.BlockSpec((1, eff_tile), lambda i: (0, i))

    out_t = pl.pallas_call(
        _make_mlp_kernel(cd),
        out_shape=jax.ShapeDtypeStruct((1, b_pad), jnp.float32),
        grid_spec=pltpu.PrefetchScalarGridSpec(
            num_scalar_prefetch=0,
            grid=grid,
            in_specs=in_specs,
            out_specs=out_spec,
        ),
        compiler_params=pltpu.CompilerParams(
            dimension_semantics=("parallel",),
        ),
    )(x, w1c, b1r, w2c, b2r, w3c, b3r, w4c, b4r, w5r, b5r)

    return out_t[0, :B].reshape(B, 1)


def init_params(key, in_dims):
    """Deterministic init mimicking torch.nn.Linear default (uniform +/- 1/sqrt(fan_in))."""
    dims = [in_dims, 32, 128, 64, 16, 1]
    params = []
    for i in range(5):
        fan_in, fan_out = dims[i], dims[i + 1]
        key, kw, kb = jax.random.split(key, 3)
        bound = 1.0 / jnp.sqrt(jnp.float32(fan_in))
        w = jax.random.uniform(kw, (fan_in, fan_out), jnp.float32, -bound, bound)
        b = jax.random.uniform(kb, (fan_out,), jnp.float32, -bound, bound)
        params.append((w, b))
    return params


def net_reference(x, params):
    """Plain-JAX reference for correctness check."""
    (w1, b1), (w2, b2), (w3, b3), (w4, b4), (w5, b5) = params
    h = jnp.maximum(x @ w1 + b1, 0.0)
    h = jnp.maximum(h @ w2 + b2, 0.0)
    h = jnp.maximum(h @ w3 + b3, 0.0)
    h = jnp.maximum(h @ w4 + b4, 0.0)
    return h @ w5 + b5


if __name__ == "__main__":
    key = jax.random.PRNGKey(0)
    in_dims = 16

    kx, kx2, kp = jax.random.split(key, 3)
    params = init_params(kp, in_dims)

    # Small-shape check (single grid step, full-array blocks).
    batch = 8
    x = jax.random.normal(kx, (batch, in_dims), jnp.float32)
    out = net_forward(x, params)
    out = jax.block_until_ready(out)
    ref = net_reference(x, params)
    assert out.shape == (batch, 1), out.shape
    assert jnp.allclose(out, ref, atol=1e-5, rtol=1e-5), "mismatch vs reference (B=8)"

    # Tiled-path check: 256-row tiles, 2 grid steps (exercises the optimized
    # configuration, incl. >=2 steps for v7x dual-TensorCore sharding).
    batch2 = 512
    x2 = jax.random.normal(kx2, (batch2, in_dims), jnp.float32)
    out2 = net_forward(x2, params, tile_b=256)
    out2 = jax.block_until_ready(out2)
    ref2 = net_reference(x2, params)
    assert out2.shape == (batch2, 1), out2.shape
    assert jnp.allclose(out2, ref2, atol=1e-4, rtol=1e-4), "mismatch vs reference (B=512)"

    print("KERNEL_OK")
</pallas_src>

<mosaic_0001>
module attributes {stable_mosaic.version = 11 : i64} {
  func.func @mlp_kernel(%arg0: i32, %arg1: memref<8x16xf32, #tpu.memory_space<vmem>>, %arg2: memref<16x32xf32, #tpu.memory_space<vmem>>, %arg3: memref<1x32xf32, #tpu.memory_space<vmem>>, %arg4: memref<32x128xf32, #tpu.memory_space<vmem>>, %arg5: memref<1x128xf32, #tpu.memory_space<vmem>>, %arg6: memref<128x64xf32, #tpu.memory_space<vmem>>, %arg7: memref<1x64xf32, #tpu.memory_space<vmem>>, %arg8: memref<64x16xf32, #tpu.memory_space<vmem>>, %arg9: memref<1x16xf32, #tpu.memory_space<vmem>>, %arg10: memref<1x16xf32, #tpu.memory_space<vmem>>, %arg11: memref<1x1xf32, #tpu.memory_space<vmem>>, %arg12: memref<1x8xf32, #tpu.memory_space<vmem>>) attributes {dimension_semantics = [#tpu.dimension_semantics<parallel>], iteration_bounds = array<i64: 1>, scalar_prefetch = 0 : i64, scratch_operands = 0 : i64, tpu.core_type = #tpu.core_type<tc>, window_params = [{transform_indices = @transform_0, window_bounds = array<i64: 8, 16>}, {pipeline_mode = #tpu.pipeline_mode<synchronous>, transform_indices = @transform_1, window_bounds = array<i64: 16, 32>}, {pipeline_mode = #tpu.pipeline_mode<synchronous>, transform_indices = @transform_2, window_bounds = array<i64: 1, 32>}, {pipeline_mode = #tpu.pipeline_mode<synchronous>, transform_indices = @transform_3, window_bounds = array<i64: 32, 128>}, {pipeline_mode = #tpu.pipeline_mode<synchronous>, transform_indices = @transform_4, window_bounds = array<i64: 1, 128>}, {pipeline_mode = #tpu.pipeline_mode<synchronous>, transform_indices = @transform_5, window_bounds = array<i64: 128, 64>}, {pipeline_mode = #tpu.pipeline_mode<synchronous>, transform_indices = @transform_6, window_bounds = array<i64: 1, 64>}, {pipeline_mode = #tpu.pipeline_mode<synchronous>, transform_indices = @transform_7, window_bounds = array<i64: 64, 16>}, {pipeline_mode = #tpu.pipeline_mode<synchronous>, transform_indices = @transform_8, window_bounds = array<i64: 1, 16>}, {pipeline_mode = #tpu.pipeline_mode<synchronous>, transform_indices = @transform_9, window_bounds = array<i64: 1, 16>}, {pipeline_mode = #tpu.pipeline_mode<synchronous>, transform_indices = @transform_10, window_bounds = array<i64: 1, 1>}, {transform_indices = @transform_11, window_bounds = array<i64: 1, 8>}]} {
    %c0 = arith.constant 0 : index
    %c0_0 = arith.constant 0 : index
    %0 = vector.load %arg1[%c0, %c0_0] : memref<8x16xf32, #tpu.memory_space<vmem>>, vector<8x16xf32>
    %c0_1 = arith.constant 0 : index
    %c0_2 = arith.constant 0 : index
    %1 = vector.load %arg2[%c0_1, %c0_2] : memref<16x32xf32, #tpu.memory_space<vmem>>, vector<16x32xf32>
    %cst = arith.constant dense<0.000000e+00> : vector<8x32xf32>
    %2 = tpu.matmul %0, %1, %cst {dimension_numbers = #tpu.dot_dimension_numbers<[1], [0], [0], [1], [0, 0, 1, 1], [], []>} : vector<8x16xf32>, vector<16x32xf32>, vector<8x32xf32> -> vector<8x32xf32>
    %c0_3 = arith.constant 0 : index
    %c0_4 = arith.constant 0 : index
    %3 = vector.load %arg3[%c0_3, %c0_4] : memref<1x32xf32, #tpu.memory_space<vmem>>, vector<1x32xf32>
    %4 = vector.broadcast %3 : vector<1x32xf32> to vector<8x32xf32>
    %5 = arith.addf %2, %4 : vector<8x32xf32>
    %cst_5 = arith.constant 0.000000e+00 : f32
    %6 = vector.broadcast %cst_5 : f32 to vector<8x32xf32>
    %7 = arith.maximumf %5, %6 : vector<8x32xf32>
    %c0_6 = arith.constant 0 : index
    %c0_7 = arith.constant 0 : index
    %8 = vector.load %arg4[%c0_6, %c0_7] : memref<32x128xf32, #tpu.memory_space<vmem>>, vector<32x128xf32>
    %cst_8 = arith.constant dense<0.000000e+00> : vector<8x128xf32>
    %9 = tpu.matmul %7, %8, %cst_8 {dimension_numbers = #tpu.dot_dimension_numbers<[1], [0], [0], [1], [0, 0, 1, 1], [], []>} : vector<8x32xf32>, vector<32x128xf32>, vector<8x128xf32> -> vector<8x128xf32>
    %c0_9 = arith.constant 0 : index
    %c0_10 = arith.constant 0 : index
    %10 = vector.load %arg5[%c0_9, %c0_10] : memref<1x128xf32, #tpu.memory_space<vmem>>, vector<1x128xf32>
    %11 = vector.broadcast %10 : vector<1x128xf32> to vector<8x128xf32>
    %12 = arith.addf %9, %11 : vector<8x128xf32>
    %cst_11 = arith.constant 0.000000e+00 : f32
    %13 = vector.broadcast %cst_11 : f32 to vector<8x128xf32>
    %14 = arith.maximumf %12, %13 : vector<8x128xf32>
    %c0_12 = arith.constant 0 : index
    %c0_13 = arith.constant 0 : index
    %15 = vector.load %arg6[%c0_12, %c0_13] : memref<128x64xf32, #tpu.memory_space<vmem>>, vector<128x64xf32>
    %cst_14 = arith.constant dense<0.000000e+00> : vector<8x64xf32>
    %16 = tpu.matmul %14, %15, %cst_14 {dimension_numbers = #tpu.dot_dimension_numbers<[1], [0], [0], [1], [0, 0, 1, 1], [], []>} : vector<8x128xf32>, vector<128x64xf32>, vector<8x64xf32> -> vector<8x64xf32>
    %c0_15 = arith.constant 0 : index
    %c0_16 = arith.constant 0 : index
    %17 = vector.load %arg7[%c0_15, %c0_16] : memref<1x64xf32, #tpu.memory_space<vmem>>, vector<1x64xf32>
    %18 = vector.broadcast %17 : vector<1x64xf32> to vector<8x64xf32>
    %19 = arith.addf %16, %18 : vector<8x64xf32>
    %cst_17 = arith.constant 0.000000e+00 : f32
    %20 = vector.broadcast %cst_17 : f32 to vector<8x64xf32>
    %21 = arith.maximumf %19, %20 : vector<8x64xf32>
    %c0_18 = arith.constant 0 : index
    %c0_19 = arith.constant 0 : index
    %22 = vector.load %arg8[%c0_18, %c0_19] : memref<64x16xf32, #tpu.memory_space<vmem>>, vector<64x16xf32>
    %cst_20 = arith.constant dense<0.000000e+00> : vector<8x16xf32>
    %23 = tpu.matmul %21, %22, %cst_20 {dimension_numbers = #tpu.dot_dimension_numbers<[1], [0], [0], [1], [0, 0, 1, 1], [], []>} : vector<8x64xf32>, vector<64x16xf32>, vector<8x16xf32> -> vector<8x16xf32>
    %c0_21 = arith.constant 0 : index
    %c0_22 = arith.constant 0 : index
    %24 = vector.load %arg9[%c0_21, %c0_22] : memref<1x16xf32, #tpu.memory_space<vmem>>, vector<1x16xf32>
    %25 = vector.broadcast %24 : vector<1x16xf32> to vector<8x16xf32>
    %26 = arith.addf %23, %25 : vector<8x16xf32>
    %cst_23 = arith.constant 0.000000e+00 : f32
    %27 = vector.broadcast %cst_23 : f32 to vector<8x16xf32>
    %28 = arith.maximumf %26, %27 : vector<8x16xf32>
    %c0_24 = arith.constant 0 : index
    %c0_25 = arith.constant 0 : index
    %29 = vector.load %arg10[%c0_24, %c0_25] : memref<1x16xf32, #tpu.memory_space<vmem>>, vector<1x16xf32>
    %cst_26 = arith.constant dense<0.000000e+00> : vector<1x8xf32>
    %30 = tpu.matmul %29, %28, %cst_26 {dimension_numbers = #tpu.dot_dimension_numbers<[1], [1], [0], [0], [0, 0, 1, 0], [], []>} : vector<1x16xf32>, vector<8x16xf32>, vector<1x8xf32> -> vector<1x8xf32>
    %c0_27 = arith.constant 0 : index
    %c0_28 = arith.constant 0 : index
    %31 = vector.load %arg11[%c0_27, %c0_28] : memref<1x1xf32, #tpu.memory_space<vmem>>, vector<1x1xf32>
    %32 = vector.broadcast %31 : vector<1x1xf32> to vector<1x8xf32>
    %33 = arith.addf %30, %32 : vector<1x8xf32>
    %c0_29 = arith.constant 0 : index
    %c0_30 = arith.constant 0 : index
    %34 = vector.load %arg12[%c0_29, %c0_30] : memref<1x8xf32, #tpu.memory_space<vmem>>, vector<1x8xf32>
    tpu.vector_store %arg12[%c0_29, %c0_30], %33 {strides = array<i32>} : memref<1x8xf32, #tpu.memory_space<vmem>>, vector<1x8xf32>,
    return
  }
  func.func @transform_0(%arg0: i32) -> (i32, i32) {
    %c0_i32 = arith.constant 0 : i32
    %c0_i32_0 = arith.constant 0 : i32
    return %arg0, %c0_i32 : i32, i32
  }
  func.func @transform_1(%arg0: i32) -> (i32, i32) {
    %c0_i32 = arith.constant 0 : i32
    %c0_i32_0 = arith.constant 0 : i32
    %c0_i32_1 = arith.constant 0 : i32
    return %c0_i32, %c0_i32_0 : i32, i32
  }
  func.func @transform_2(%arg0: i32) -> (i32, i32) {
    %c0_i32 = arith.constant 0 : i32
    %c0_i32_0 = arith.constant 0 : i32
    %c0_i32_1 = arith.constant 0 : i32
    return %c0_i32, %c0_i32_0 : i32, i32
  }
  func.func @transform_3(%arg0: i32) -> (i32, i32) {
    %c0_i32 = arith.constant 0 : i32
    %c0_i32_0 = arith.constant 0 : i32
    %c0_i32_1 = arith.constant 0 : i32
    return %c0_i32, %c0_i32_0 : i32, i32
  }
  func.func @transform_4(%arg0: i32) -> (i32, i32) {
    %c0_i32 = arith.constant 0 : i32
    %c0_i32_0 = arith.constant 0 : i32
    %c0_i32_1 = arith.constant 0 : i32
    return %c0_i32, %c0_i32_0 : i32, i32
  }
  func.func @transform_5(%arg0: i32) -> (i32, i32) {
    %c0_i32 = arith.constant 0 : i32
    %c0_i32_0 = arith.constant 0 : i32
    %c0_i32_1 = arith.constant 0 : i32
    return %c0_i32, %c0_i32_0 : i32, i32
  }
  func.func @transform_6(%arg0: i32) -> (i32, i32) {
    %c0_i32 = arith.constant 0 : i32
    %c0_i32_0 = arith.constant 0 : i32
    %c0_i32_1 = arith.constant 0 : i32
    return %c0_i32, %c0_i32_0 : i32, i32
  }
  func.func @transform_7(%arg0: i32) -> (i32, i32) {
    %c0_i32 = arith.constant 0 : i32
    %c0_i32_0 = arith.constant 0 : i32
    %c0_i32_1 = arith.constant 0 : i32
    return %c0_i32, %c0_i32_0 : i32, i32
  }
  func.func @transform_8(%arg0: i32) -> (i32, i32) {
    %c0_i32 = arith.constant 0 : i32
    %c0_i32_0 = arith.constant 0 : i32
    %c0_i32_1 = arith.constant 0 : i32
    return %c0_i32, %c0_i32_0 : i32, i32
  }
  func.func @transform_9(%arg0: i32) -> (i32, i32) {
    %c0_i32 = arith.constant 0 : i32
    %c0_i32_0 = arith.constant 0 : i32
    %c0_i32_1 = arith.constant 0 : i32
    return %c0_i32, %c0_i32_0 : i32, i32
  }
  func.func @transform_10(%arg0: i32) -> (i32, i32) {
    %c0_i32 = arith.constant 0 : i32
    %c0_i32_0 = arith.constant 0 : i32
    %c0_i32_1 = arith.constant 0 : i32
    return %c0_i32, %c0_i32_0 : i32, i32
  }
  func.func @transform_11(%arg0: i32) -> (i32, i32) {
    %c0_i32 = arith.constant 0 : i32
    %c0_i32_0 = arith.constant 0 : i32
    return %c0_i32, %arg0 : i32, i32
  }
}

</mosaic_0001>

<bundles_post_ra>
// kernel: tpu_custom_call.1
= control target key start
LH: loop header
LB: loop body
LE: loop exit
PB: predicated region body
PF: predicated region fallthrough
CT: control target
= control target key end

     0   :  { %s913_s0 = inlined_call_operand.vmem [shape: f32[8,16], index: 0, kind: input, shape index: {}]   ;;  %s914_s1 = inlined_call_operand.vmem [shape: f32[16,32], index: 1, kind: input, shape index: {}]   ;;  %s915_s2 = inlined_call_operand.vmem [shape: f32[1,32], index: 2, kind: input, shape index: {}]   ;;  %s916_s3 = inlined_call_operand.vmem [shape: f32[32,128], index: 3, kind: input, shape index: {}]   ;;  %s917_s4 = inlined_call_operand.vmem [shape: f32[1,128], index: 4, kind: input, shape index: {}]   ;;  %s918_s5 = inlined_call_operand.vmem [shape: f32[128,64], index: 5, kind: input, shape index: {}]   ;;  %s919_s6 = inlined_call_operand.vmem [shape: f32[1,64], index: 6, kind: input, shape index: {}]   ;;  %s920_s7 = inlined_call_operand.vmem [shape: f32[64,16], index: 7, kind: input, shape index: {}]   ;;  %s921_s8 = inlined_call_operand.vmem [shape: f32[1,16], index: 8, kind: input, shape index: {}]   ;;  %s922_s9 = inlined_call_operand.vmem [shape: f32[1,16], index: 9, kind: input, shape index: {}]   ;;  %s923_s10 = inlined_call_operand.<no memory space> [shape: f32[1,1], index: 10, kind: input, shape index: {}]   ;;  %s924_s11 = inlined_call_operand.hbm [shape: f32[1,8], index: 11, kind: output, shape index: {}]  }
   0x1   :  { %v16_v0 = vstv %s923_s10 }
   0x2   :  { %17 = vst [vmem:[#allocation2] sm:$0x1] %v16_v0 }
   0x3   :  { %v42_v1 = vld [vmem:[%s914_s1] sm:$0xff]  ;;  %v43_v2 = vld [vmem:[%s914_s1 + $0x8] sm:$0xff]  ;;  %v696_v3 = vmov 0.0|0.0   ;;  %vm697_vm0 = vmmov 0   ;;  %v698_v5 = vmov 0.0  }
   0x4   :  { %621 = vmatprep.subr.bf16.mxu1 %v696_v3  ;;  %v622_v4 = vpack.c.bf16 %v43_v2, %v42_v1  ;;  %548 = vmatprep.mubr.msk.f32.mxu1 %vm697_vm0, %v698_v5  ;;  %v126_v6 = vld [vmem:[%s916_s3] sm:$0xff]  ;;  %v127_v7 = vld [vmem:[%s916_s3 + $0x8] sm:$0xff] }
   0x5   :  { %630 = vmatprep.subr.bf16.mxu0 %v696_v3  ;;  %594 = vmatprep.mubr.msk.f32.mxu0 %vm697_vm0, %v698_v5 }
   0x6   :  { %18 = vsyncpa [#allocation4], 0  ;;  %623 = vmatpush3.bf16.msra.mxu1 %v622_v4  ;;  %v41_v8 = vld [vmem:[%s913_s0] sm:$0xff]  ;;  %vm51_vm1 = vcmask 130048   ;;  %v625_v9 = vpack.c.bf16 %v127_v7, %v126_v6  ;;  %v128_v10 = vld [vmem:[%s916_s3 + $0x10] sm:$0xff]  ;;  %vm137_vm2 = vcmask 261120  }
   0x7   :  { %624 = vmatprep.subr.bf16.mxu1 %v696_v3  ;;  %v129_v11 = vld [vmem:[%s916_s3 + $0x18] sm:$0xff]  ;;  %v212_v13 = vld [vmem:[%s918_s5] sm:$0xff]  ;;  %v213_v14 = vld [vmem:[%s918_s5 + $0x8] sm:$0xff]  ;;  %vm321_vm3 = vcmask 523264   ;;  %v699_v1 = vmov 0   ;;  %s700_s18 = smov [#allocation3]  }
   0x8   :  { %v628_v12 = vpack.c.bf16 %v129_v11, %v128_v10  ;;  %v214_v15 = vld [vmem:[%s918_s5 + $0x10] sm:$0xff]  ;;  %v631_v16 = vpack.c.bf16 %v213_v14, %v212_v13  ;;  %v215_v17 = vld [vmem:[%s918_s5 + $0x18] sm:$0xff]  ;;  %v216_v19 = vld [vmem:[%s918_s5 + $0x20] sm:$0xff]  ;;  %671 = vset.pattern.permute.xlu0 %v699_v1  ;;  %s491_s3 = sshll.u32 %s700_s18, 4  ;;  %vm483_vm4 = vcmask 57344   ;;  %s492_s3 = int_to_ptr.vmem [resolvable:$true] %s491_s3 }
   0x9   :  { %549 = vmatmul.mubr.msk.f32.vlgmr.msra.gmra.mrb[0].mxu1 %vm51_vm1, %v41_v8  ;;  %v634_v18 = vpack.c.bf16 %v215_v17, %v214_v15  ;;  %v217_v20 = vld [vmem:[%s918_s5 + $0x28] sm:$0xff]  ;;  %v218_v22 = vld [vmem:[%s918_s5 + $0x30] sm:$0xff]  ;;  %v219_v23 = vld [vmem:[%s918_s5 + $0x38] sm:$0xff]  ;;  %s676_s19 = scalar_lea.vmem %s492_s3, 32  ;;  %p677_p1 = scmp.lt.s32.totalorder %s492_s3, %s492_s3 }
   0xa   :  { %626 = vmatpush3.bf16.msra.mxu1 %v625_v9  ;;  %559 = vmatprep.mubr.msk.f32.mxu1 %vm697_vm0, %v698_v5  ;;  %v637_v21 = vpack.c.bf16 %v217_v20, %v216_v19  ;;  %v640_v24 = vpack.c.bf16 %v219_v23, %v218_v22  ;;  %v220_v25 = vld [vmem:[%s918_s5 + $0x40] sm:$0xff]  ;;  %v221_v26 = vld [vmem:[%s918_s5 + $0x48] sm:$0xff]  ;;  %v222_v28 = vld [vmem:[%s918_s5 + $0x50] sm:$0xff] }
   0xb   :  { %627 = vmatprep.subr.bf16.mxu1 %v696_v3  ;;  %632 = vmatpush3.bf16.msra.mxu0 %v631_v16  ;;  %v643_v27 = vpack.c.bf16 %v221_v26, %v220_v25  ;;  %v223_v29 = vld [vmem:[%s918_s5 + $0x58] sm:$0xff]  ;;  %v224_v31 = vld [vmem:[%s918_s5 + $0x60] sm:$0xff]  ;;  %v225_v32 = vld [vmem:[%s918_s5 + $0x68] sm:$0xff] }
   0xc   :  { %633 = vmatprep.subr.bf16.mxu0 %v696_v3  ;;  %v646_v30 = vpack.c.bf16 %v223_v29, %v222_v28  ;;  %v649_v33 = vpack.c.bf16 %v225_v32, %v224_v31  ;;  %v499_v34 = vld [vmem:[%s915_s2] ss:$0 sm:$0xff]  ;;  %v226_v39 = vld [vmem:[%s918_s5 + $0x70] sm:$0xff]  ;;  %v227_v40 = vld [vmem:[%s918_s5 + $0x78] sm:$0xff] }
   0xd   :  { %v652_v41 = vpack.c.bf16 %v227_v40, %v226_v39  ;;  %v306_v42 = vld [vmem:[%s920_s7] sm:$0xff]  ;;  %v307_v43 = vld [vmem:[%s920_s7 + $0x8] sm:$0xff]  ;;  %v308_v44 = vld [vmem:[%s920_s7 + $0x10] sm:$0xff] }
   0xe   :  { %629 = vmatpush3.bf16.msra.mxu1 %v628_v12  ;;  %v655_v45 = vpack.c.bf16 %v307_v43, %v306_v42  ;;  %v309_v46 = vld [vmem:[%s920_s7 + $0x18] sm:$0xff]  ;;  %v310_v48 = vld [vmem:[%s920_s7 + $0x20] sm:$0xff]  ;;  %v311_v49 = vld [vmem:[%s920_s7 + $0x28] sm:$0xff] }
   0xf   :  { %654 = vmatprep.subr.bf16.mxu1 %v696_v3  ;;  %635 = vmatpush3.bf16.msra.mxu0 %v634_v18  ;;  %v658_v47 = vpack.c.bf16 %v309_v46, %v308_v44  ;;  %v661_v50 = vpack.c.bf16 %v311_v49, %v310_v48  ;;  %v501_v51 = vld [vmem:[%s917_s4] ss:$0 sm:$0xff]  ;;  %v312_v56 = vld [vmem:[%s920_s7 + $0x30] sm:$0xff]  ;;  %v313_v57 = vld [vmem:[%s920_s7 + $0x38] sm:$0xff] }
  0x10   :  { %636 = vmatprep.subr.bf16.mxu0 %v696_v3  ;;  %v664_v58 = vpack.c.bf16 %v313_v57, %v312_v56  ;;  %v503_v59 = vld [vmem:[%s919_s6] ss:$0 sm:$0xff] }
  0x11   :  { %v397_v0 = vld [vmem:[#allocation2] sm:$0x1] }
  0x12   :  { %400 = vperm.xlu0 %671, %v397_v0   ;;  %v504_v2 = vld [vmem:[%s921_s8] ss:$0 sm:$0xff]  ;;  %s672_s8 = scalar_lea.vmem %s492_s3, 16 }
  0x13   :  { %638 = vmatpush3.bf16.msra.mxu0 %v637_v21  ;;  %v396_v8 = vld [vmem:[%s922_s9] sm:$0x1]  ;;  %p673_p0 = scmp.ne.s32.totalorder %s492_s3, %s672_s8  ;;  %p678_p2 = scmp.lt.s32.totalorder %s676_s19, %s672_s8 }
  0x14   :  { %639 = vmatprep.subr.bf16.mxu0 %v696_v3 }
  0x15   :  { %p679_p3 = por %p678_p2, %p677_p1 }
  0x17   :  { %641 = vmatpush3.bf16.msra.mxu0 %v640_v24  ;;  %p680_p4 = pnand %p679_p3, %p673_p0 }
  0x18   :  { %642 = vmatprep.subr.bf16.mxu0 %v696_v3 }
  0x1b   :  { %644 = vmatpush3.bf16.msra.mxu0 %v643_v27 }
  0x1c   :  { %645 = vmatprep.subr.bf16.mxu0 %v696_v3 }
  0x1f   :  { %647 = vmatpush3.bf16.msra.mxu0 %v646_v30 }
  0x20   :  { %648 = vmatprep.subr.bf16.mxu0 %v696_v3 }
  0x23   :  { %650 = vmatpush3.bf16.msra.mxu0 %v649_v33 }
  0x24   :  { %651 = vmatprep.subr.bf16.mxu0 %v696_v3 }
  0x27   :  { %653 = vmatpush3.bf16.msra.mxu0 %v652_v41 }
  0x91   :  { %v401_v11 = vpop.permute.xlu0 %400 }
  0xdc   :  { %v121_v35 = vpop.f32.mrb[0].mxu1 }
  0xdd   :  { %v122_v36 = vadd.f32 %v499_v34, %v121_v35  ;;  %v550_v37 = vpop.f32.mrb[1].mxu1 }
  0xdf   :  { %v125_v38 = vmax.f32 %v122_v36, 0.0 }
  0xe1   :  { %560 = vmatmul.mubr.msk.f32.vlgmr.msra.gmra.mrb[2].mxu1 %vm137_vm2, %v125_v38 }
  0xe2   :  { %613 = vmatprep.mubr.msk.f32.mxu1 %vm697_vm0, %v698_v5  ;;  %656 = vmatpush3.bf16.msra.mxu1 %v655_v45 }
  0xe3   :  { %657 = vmatprep.subr.bf16.mxu1 %v696_v3 }
  0xe6   :  { %659 = vmatpush3.bf16.msra.mxu1 %v658_v47 }
  0xe7   :  { %660 = vmatprep.subr.bf16.mxu1 %v696_v3 }
  0xea   :  { %662 = vmatpush3.bf16.msra.mxu1 %v661_v50 }
  0xeb   :  { %663 = vmatprep.subr.bf16.mxu1 %v696_v3 }
  0xee   :  { %665 = vmatpush3.bf16.msra.mxu1 %v664_v58 }
  0xef   :  { %616 = vmatprep.subr.mxu1 %v698_v5 }
 0x1b4   :  { %v207_v52 = vpop.f32.mrb[2].mxu1 }
 0x1b5   :  { %v208_v53 = vadd.f32 %v501_v51, %v207_v52  ;;  %v561_v54 = vpop.f32.mrb[3].mxu1 }
 0x1b7   :  { %v211_v55 = vmax.f32 %v208_v53, 0.0 }
 0x1b9   :  { %595 = vmatmul.mubr.f32.vlgmr.msra.gmra.mrb[0].mxu0 %v211_v55 }
 0x28c   :  { %v301_v60 = vpop.f32.mrb[0].mxu0 }
 0x28d   :  { %v302_v61 = vadd.f32 %v503_v59, %v301_v60  ;;  %v596_v62 = vpop.f32.mrb[1].mxu0 }
 0x28f   :  { %v305_v63 = vmax.f32 %v302_v61, 0.0 }
 0x291   :  { %614 = vmatmul.mubr.msk.f32.vlgmr.msra.gmra.mrb[4].mxu1 %vm321_vm3, %v305_v63 }
 0x292   :  { %618 = vmatprep.mubr.msk.f32.mxu1 %vm697_vm0, %v698_v5  ;;  %v403_v5 = vlaneseq }
 0x294   :  { %v404_v9 = vshrl.u32 %v403_v5, 7 }
 0x296   :  { %v405_v10 = vsub.s32 0, %v404_v9 }
 0x298   :  { %v406_v12 = vrot.slane %v401_v11, %v405_v10 }
 0x364   :  { %v391_v3 = vpop.f32.mrb[4].mxu1 }
 0x365   :  { %v392_v4 = vadd.f32 %v504_v2, %v391_v3  ;;  %v615_v6 = vpop.f32.mrb[5].mxu1 }
 0x367   :  { %v395_v7 = vmax.f32 %v392_v4, 0.0 }
 0x369   :  { %617 = vmatpush3.xpose.msk.msra.mxu1 %vm51_vm1, %v395_v7 }
 0x36c   :  { %619 = vmatmul.mubr.msk.f32.vlgmr.msra.gmra.mrb[6].mxu1 %vm51_vm1, %v396_v8 }
 0x43f   :  { %v479_v13 = vpop.f32.mrb[6].mxu1 }
 0x440   :  { %v480_v14 = vadd.f32 %v479_v13, %v406_v12  ;;  %v620_v15 = vpop.f32.mrb[7].mxu1 }
 0x442   :  { %484 = vst.msk [vmem:[#allocation3] sm:$0x1] %vm483_vm4, %v480_v14 }
 0x443   :  { %683 = shalt.err (!%p680_p4)
}
 0x444   :  { %s684_s2 = scalar_lea.hbm %s924_s11, 16 }
 0x445   :  { %p685_p5 = scmp.ne.s32.totalorder %s924_s11, %s684_s2  ;;  %p688_p6 = scmp.lt.u32.totalorder %s684_s2, %s924_s11 }
 0x447   :  { %p690_p7 = pnand %p688_p6, %p685_p5 }
 0x449   :  { %693 = shalt.err (!%p690_p7)
}
 0x44a   :  { %494 = dma.vmem_to_hbm [thread:$0]  %s492_s3, 16, %s924_s11, [#allocation4]  }
 0x44b   :  { %694 = dma.done.wait [#allocation4], 16  }
 0x44c   :  { %695 = vsyncadd [#allocation4], 4294967280 }
 0x44d   :  { %498 = vsyncpa [#allocation4], 1 }

</bundles_post_ra>
